<compile_context>
chip_gen: v6e
topology: v6e:2x2x1
jax: 0.10.0
libtpu: 0.0.40
codegen_flags: <defaults>
</compile_context>

<pallas_src>
import math

import jax
import jax.numpy as jnp
from jax.experimental import pallas as pl
from jax.experimental.pallas import tpu as pltpu

EPS = 1e-12
_LOG_EPS = math.log(EPS)


def _ce_kernel(pred_ref, tgt_ref, loss_ref, m_sc, s_sc, p_sc):
    """Unweighted: per-row loss = -pred[i,t_i] + log(sum_j exp(pred[i,j]+eps))."""
    j = pl.program_id(1)
    nj = pl.num_programs(1)

    @pl.when(j == 0)
    def _():
        m_sc[...] = jnp.full_like(m_sc, -jnp.inf)
        s_sc[...] = jnp.zeros_like(s_sc)
        p_sc[...] = jnp.zeros_like(p_sc)

    pred = pred_ref[...].astype(jnp.float32)        # [tn, tm]
    tgt = tgt_ref[...]                              # [tn, 1] int32 (global col id)
    tn, tm = pred.shape
    cols = j * tm + jax.lax.broadcasted_iota(jnp.int32, (tn, tm), 1)

    # Fused "gather": target falls in exactly one column tile per row.
    p_sc[...] += jnp.sum(jnp.where(cols == tgt, pred, 0.0), axis=1, keepdims=True)

    # Online (streaming) log-sum-exp of z = pred + eps (max-subtracted).
    z = pred + EPS
    m_prev = m_sc[...]
    m_new = jnp.maximum(m_prev, jnp.max(z, axis=1, keepdims=True))
    s_sc[...] = s_sc[...] * jnp.exp(m_prev - m_new) + jnp.sum(
        jnp.exp(z - m_new), axis=1, keepdims=True)
    m_sc[...] = m_new

    @pl.when(j == nj - 1)
    def _():
        lse = m_sc[...] + jnp.log(s_sc[...])
        loss_ref[...] = (lse - p_sc[...]).astype(loss_ref.dtype)


def _ce_weighted_kernel(pred_ref, tgt_ref, w_ref, loss_ref, m_sc, s_sc, p_sc):
    """Weighted: per-row loss = -pred[i,t_i] + log(sum_j exp(pred[i,j]*w[i,j]) + eps)."""
    i = pl.program_id(0)
    j = pl.program_id(1)
    nj = pl.num_programs(1)

    @pl.when(j == 0)
    def _():
        m_sc[...] = jnp.full_like(m_sc, -jnp.inf)
        s_sc[...] = jnp.zeros_like(s_sc)
        p_sc[...] = jnp.zeros_like(p_sc)

    pred = pred_ref[...].astype(jnp.float32)        # [tn, tm]
    w = w_ref[...].astype(jnp.float32)              # [tn, tm]
    tgt = tgt_ref[...]                              # [tn, 1] int32
    tn, tm = pred.shape
    rows = i * tn + jax.lax.broadcasted_iota(jnp.int32, (tn, tm), 0)
    cols = j * tm + jax.lax.broadcasted_iota(jnp.int32, (tn, tm), 1)

    # weight[k, k] = 1 done in-kernel (no HBM copy of W in the wrapper).
    w_eff = jnp.where(rows == cols, 1.0, w)

    p_sc[...] += jnp.sum(jnp.where(cols == tgt, pred, 0.0), axis=1, keepdims=True)

    z = pred * w_eff
    m_prev = m_sc[...]
    m_new = jnp.maximum(m_prev, jnp.max(z, axis=1, keepdims=True))
    s_sc[...] = s_sc[...] * jnp.exp(m_prev - m_new) + jnp.sum(
        jnp.exp(z - m_new), axis=1, keepdims=True)
    m_sc[...] = m_new

    @pl.when(j == nj - 1)
    def _():
        # log(sum_j exp(pred*w) + eps), computed stably: s >= 1 so a is finite.
        a = m_sc[...] + jnp.log(s_sc[...])
        b = jnp.float32(_LOG_EPS)
        hi = jnp.maximum(a, b)
        lse = hi + jnp.log(jnp.exp(a - hi) + jnp.exp(b - hi))
        loss_ref[...] = (lse - p_sc[...]).astype(loss_ref.dtype)


def _pick_tile(dim, candidates):
    for c in candidates:
        if dim % c == 0:
            return c
    return dim  # fall back to the full extent (always legal for BlockSpec)


def ce_loss(pred, target, hard_negative_weight=None, *, tile_n=None, tile_m=None):
    """Pallas implementation of CELoss.forward. Returns a scalar (f32)."""
    n, m = pred.shape
    if tile_n is None:
        tile_n = _pick_tile(n, (256, 128, 64, 32, 16, 8))
    if tile_m is None:
        tile_m = _pick_tile(m, (2048, 1024, 512, 256, 128))
    assert n % tile_n == 0 and m % tile_m == 0

    tgt_col = target.astype(jnp.int32).reshape(n, 1)
    grid = (n // tile_n, m // tile_m)

    pred_spec = pl.BlockSpec((tile_n, tile_m), lambda i, j: (i, j))
    tgt_spec = pl.BlockSpec((tile_n, 1), lambda i, j: (i, 0))
    out_spec = pl.BlockSpec((tile_n, 1), lambda i, j: (i, 0))
    out_shape = jax.ShapeDtypeStruct((n, 1), jnp.float32)
    scratch = [pltpu.VMEM((tile_n, 1), jnp.float32)] * 3

    compiler_params = pltpu.CompilerParams(
        dimension_semantics=("parallel", "arbitrary"),
        vmem_limit_bytes=32 * 1024 * 1024,
    )

    pred_bytes = n * m * jnp.dtype(pred.dtype).itemsize

    if hard_negative_weight is None:
        cost = pl.CostEstimate(
            flops=3 * n * m,
            transcendentals=n * m,
            bytes_accessed=pred_bytes + 4 * n + 4 * n,
        )
        per_row = pl.pallas_call(
            _ce_kernel,
            out_shape=out_shape,
            grid=grid,
            in_specs=[pred_spec, tgt_spec],
            out_specs=out_spec,
            scratch_shapes=scratch,
            compiler_params=compiler_params,
            cost_estimate=cost,
        )(pred, tgt_col)
    else:
        w = hard_negative_weight  # native dtype; diagonal fixed inside the kernel
        w_spec = pl.BlockSpec((tile_n, tile_m), lambda i, j: (i, j))
        w_bytes = n * m * jnp.dtype(w.dtype).itemsize
        cost = pl.CostEstimate(
            flops=5 * n * m,
            transcendentals=n * m,
            bytes_accessed=pred_bytes + w_bytes + 4 * n + 4 * n,
        )
        per_row = pl.pallas_call(
            _ce_weighted_kernel,
            out_shape=out_shape,
            grid=grid,
            in_specs=[pred_spec, tgt_spec, w_spec],
            out_specs=out_spec,
            scratch_shapes=scratch,
            compiler_params=compiler_params,
            cost_estimate=cost,
        )(pred, tgt_col, w)

    # torch's mean over the [N,1]+[N] broadcast equals the mean of per-row losses.
    return jnp.mean(per_row.astype(jnp.float32))


def _ce_loss_ref(pred, target, hard_negative_weight=None):
    """Pure-JAX reference mirroring the PyTorch forward (incl. [N,N] broadcast mean)."""
    pred = pred.astype(jnp.float32)
    n = pred.shape[0]
    picked = jnp.take_along_axis(pred, target.reshape(n, 1).astype(jnp.int32), axis=1)
    if hard_negative_weight is not None:
        idx = jnp.arange(n)
        w = hard_negative_weight.astype(jnp.float32).at[idx, idx].set(1.0)
        term = jnp.log(jnp.sum(jnp.exp(pred * w), axis=1) + EPS)
    else:
        term = jnp.log(jnp.sum(jnp.exp(pred + EPS), axis=1))
    loss = -1.0 * picked + term[None, :]          # [N, N] broadcast, as in torch
    return jnp.mean(loss)


if __name__ == "__main__":
    key = jax.random.PRNGKey(0)
    k1, k2, k3 = jax.random.split(key, 3)

    # Small contrastive batch: N=8 rows, M=32 candidate columns.
    N, M = 8, 32
    pred = jax.random.normal(k1, (N, M), dtype=jnp.float32)
    target = jax.random.randint(k2, (N,), 0, M, dtype=jnp.int32)
    hnw = jax.random.uniform(k3, (N, M), dtype=jnp.float32)

    # Unweighted path.
    out = jax.block_until_ready(ce_loss(pred, target))
    ref = jax.block_until_ready(_ce_loss_ref(pred, target))
    assert jnp.allclose(out, ref, atol=1e-5, rtol=1e-5), (out, ref)

    # Weighted (hard negative) path.
    out_w = jax.block_until_ready(ce_loss(pred, target, hnw))
    ref_w = jax.block_until_ready(_ce_loss_ref(pred, target, hnw))
    assert jnp.allclose(out_w, ref_w, atol=1e-5, rtol=1e-5), (out_w, ref_w)

    # Exercise the multi-tile grid / online-LSE / in-kernel diagonal-fix path.
    N2, M2 = 16, 256
    k4, k5, k6 = jax.random.split(jax.random.PRNGKey(1), 3)
    pred2 = jax.random.normal(k4, (N2, M2), dtype=jnp.float32) * 4.0
    target2 = jax.random.randint(k5, (N2,), 0, M2, dtype=jnp.int32)
    hnw2 = jax.random.uniform(k6, (N2, M2), dtype=jnp.float32)

    out2 = jax.block_until_ready(ce_loss(pred2, target2, hnw2, tile_n=8, tile_m=128))
    ref2 = jax.block_until_ready(_ce_loss_ref(pred2, target2, hnw2))
    assert jnp.allclose(out2, ref2, atol=1e-4, rtol=1e-4), (out2, ref2)

    out3 = jax.block_until_ready(ce_loss(pred2, target2, tile_n=8, tile_m=128))
    ref3 = jax.block_until_ready(_ce_loss_ref(pred2, target2))
    assert jnp.allclose(out3, ref3, atol=1e-4, rtol=1e-4), (out3, ref3)

    print("KERNEL_OK")
</pallas_src>

<mosaic_0001>
module attributes {stable_mosaic.version = 11 : i64} {
  func.func @_ce_kernel(%arg0: i32, %arg1: i32, %arg2: memref<8x32xf32, #tpu.memory_space<vmem>>, %arg3: memref<8x1xi32, #tpu.memory_space<vmem>>, %arg4: memref<8x1xf32, #tpu.memory_space<vmem>>, %arg5: memref<8x1xf32, #tpu.memory_space<vmem>>, %arg6: memref<8x1xf32, #tpu.memory_space<vmem>>, %arg7: memref<8x1xf32, #tpu.memory_space<vmem>>) attributes {dimension_semantics = [#tpu.dimension_semantics<parallel>, #tpu.dimension_semantics<arbitrary>], iteration_bounds = array<i64: 1, 1>, scalar_prefetch = 0 : i64, scratch_operands = 3 : i64, tpu.core_type = #tpu.core_type<tc>, window_params = [{transform_indices = @transform_0, window_bounds = array<i64: 8, 32>}, {transform_indices = @transform_1, window_bounds = array<i64: 8, 1>}, {transform_indices = @transform_2, window_bounds = array<i64: 8, 1>}]} {
    %c0_i32 = arith.constant 0 : i32
    %0 = arith.cmpi eq, %arg1, %c0_i32 : i32
    %1 = arith.extui %0 : i1 to i32
    %c0_i32_0 = arith.constant 0 : i32
    %2 = arith.cmpi ne, %1, %c0_i32_0 : i32
    scf.if %2 {
      %cst_22 = arith.constant 0xFF800000 : f32
      %39 = vector.broadcast %cst_22 : f32 to vector<8x1xf32>
      %c0_23 = arith.constant 0 : index
      %c0_24 = arith.constant 0 : index
      %40 = vector.load %arg5[%c0_23, %c0_24] : memref<8x1xf32, #tpu.memory_space<vmem>>, vector<8x1xf32>
      tpu.vector_store %arg5[%c0_23, %c0_24], %39 {strides = array<i32>} : memref<8x1xf32, #tpu.memory_space<vmem>>, vector<8x1xf32>,
      %cst_25 = arith.constant 0.000000e+00 : f32
      %41 = vector.broadcast %cst_25 : f32 to vector<8x1xf32>
      %c0_26 = arith.constant 0 : index
      %c0_27 = arith.constant 0 : index
      %42 = vector.load %arg6[%c0_26, %c0_27] : memref<8x1xf32, #tpu.memory_space<vmem>>, vector<8x1xf32>
      tpu.vector_store %arg6[%c0_26, %c0_27], %41 {strides = array<i32>} : memref<8x1xf32, #tpu.memory_space<vmem>>, vector<8x1xf32>,
      %cst_28 = arith.constant 0.000000e+00 : f32
      %43 = vector.broadcast %cst_28 : f32 to vector<8x1xf32>
      %c0_29 = arith.constant 0 : index
      %c0_30 = arith.constant 0 : index
      %44 = vector.load %arg7[%c0_29, %c0_30] : memref<8x1xf32, #tpu.memory_space<vmem>>, vector<8x1xf32>
      tpu.vector_store %arg7[%c0_29, %c0_30], %43 {strides = array<i32>} : memref<8x1xf32, #tpu.memory_space<vmem>>, vector<8x1xf32>,
    } else {
    }
    %c0 = arith.constant 0 : index
    %c0_1 = arith.constant 0 : index
    %3 = vector.load %arg2[%c0, %c0_1] : memref<8x32xf32, #tpu.memory_space<vmem>>, vector<8x32xf32>
    %c0_2 = arith.constant 0 : index
    %c0_3 = arith.constant 0 : index
    %4 = vector.load %arg3[%c0_2, %c0_3] : memref<8x1xi32, #tpu.memory_space<vmem>>, vector<8x1xi32>
    %c32_i32 = arith.constant 32 : i32
    %5 = arith.muli %arg1, %c32_i32 : i32
    %6 = tpu.iota {dimensions = array<i32: 1>} : vector<8x32xi32>
    %7 = vector.broadcast %5 : i32 to vector<8x32xi32>
    %8 = arith.addi %7, %6 : vector<8x32xi32>
    %c0_4 = arith.constant 0 : index
    %c0_5 = arith.constant 0 : index
    %9 = vector.load %arg7[%c0_4, %c0_5] : memref<8x1xf32, #tpu.memory_space<vmem>>, vector<8x1xf32>
    %10 = vector.broadcast %4 : vector<8x1xi32> to vector<8x32xi32>
    %11 = arith.cmpi eq, %8, %10 : vector<8x32xi32>
    %cst = arith.constant 0.000000e+00 : f32
    %12 = vector.broadcast %cst : f32 to vector<8x32xf32>
    %13 = arith.select %11, %3, %12 : vector<8x32xi1>, vector<8x32xf32>
    %cst_6 = arith.constant dense<0.000000e+00> : vector<8xf32>
    %14 = vector.multi_reduction <add>, %13, %cst_6 [1] : vector<8x32xf32> to vector<8xf32>
    %15 = vector.shape_cast %14 : vector<8xf32> to vector<8x1xf32>
    %16 = arith.addf %9, %15 : vector<8x1xf32>
    %c0_7 = arith.constant 0 : index
    %c0_8 = arith.constant 0 : index
    %17 = vector.load %arg7[%c0_7, %c0_8] : memref<8x1xf32, #tpu.memory_space<vmem>>, vector<8x1xf32>
    tpu.vector_store %arg7[%c0_7, %c0_8], %16 {strides = array<i32>} : memref<8x1xf32, #tpu.memory_space<vmem>>, vector<8x1xf32>,
    %cst_9 = arith.constant 9.99999996E-13 : f32
    %18 = vector.broadcast %cst_9 : f32 to vector<8x32xf32>
    %19 = arith.addf %3, %18 : vector<8x32xf32>
    %c0_10 = arith.constant 0 : index
    %c0_11 = arith.constant 0 : index
    %20 = vector.load %arg5[%c0_10, %c0_11] : memref<8x1xf32, #tpu.memory_space<vmem>>, vector<8x1xf32>
    %cst_12 = arith.constant dense<0xFF800000> : vector<8xf32>
    %21 = vector.multi_reduction <maximumf>, %19, %cst_12 [1] : vector<8x32xf32> to vector<8xf32>
    %22 = vector.shape_cast %21 : vector<8xf32> to vector<8x1xf32>
    %23 = arith.maximumf %20, %22 : vector<8x1xf32>
    %c0_13 = arith.constant 0 : index
    %c0_14 = arith.constant 0 : index
    %24 = vector.load %arg6[%c0_13, %c0_14] : memref<8x1xf32, #tpu.memory_space<vmem>>, vector<8x1xf32>
    %25 = arith.subf %20, %23 : vector<8x1xf32>
    %26 = math.exp %25 : vector<8x1xf32>
    %27 = arith.mulf %24, %26 : vector<8x1xf32>
    %28 = vector.broadcast %23 : vector<8x1xf32> to vector<8x32xf32>
    %29 = arith.subf %19, %28 : vector<8x32xf32>
    %30 = math.exp %29 : vector<8x32xf32>
    %cst_15 = arith.constant dense<0.000000e+00> : vector<8xf32>
    %31 = vector.multi_reduction <add>, %30, %cst_15 [1] : vector<8x32xf32> to vector<8xf32>
    %32 = vector.shape_cast %31 : vector<8xf32> to vector<8x1xf32>
    %33 = arith.addf %27, %32 : vector<8x1xf32>
    %c0_16 = arith.constant 0 : index
    %c0_17 = arith.constant 0 : index
    %34 = vector.load %arg6[%c0_16, %c0_17] : memref<8x1xf32, #tpu.memory_space<vmem>>, vector<8x1xf32>
    tpu.vector_store %arg6[%c0_16, %c0_17], %33 {strides = array<i32>} : memref<8x1xf32, #tpu.memory_space<vmem>>, vector<8x1xf32>,
    %c0_18 = arith.constant 0 : index
    %c0_19 = arith.constant 0 : index
    %35 = vector.load %arg5[%c0_18, %c0_19] : memref<8x1xf32, #tpu.memory_space<vmem>>, vector<8x1xf32>
    tpu.vector_store %arg5[%c0_18, %c0_19], %23 {strides = array<i32>} : memref<8x1xf32, #tpu.memory_space<vmem>>, vector<8x1xf32>,
    %c0_i32_20 = arith.constant 0 : i32
    %36 = arith.cmpi eq, %arg1, %c0_i32_20 : i32
    %37 = arith.extui %36 : i1 to i32
    %c0_i32_21 = arith.constant 0 : i32
    %38 = arith.cmpi ne, %37, %c0_i32_21 : i32
    scf.if %38 {
      %c0_22 = arith.constant 0 : index
      %c0_23 = arith.constant 0 : index
      %39 = vector.load %arg5[%c0_22, %c0_23] : memref<8x1xf32, #tpu.memory_space<vmem>>, vector<8x1xf32>
      %c0_24 = arith.constant 0 : index
      %c0_25 = arith.constant 0 : index
      %40 = vector.load %arg6[%c0_24, %c0_25] : memref<8x1xf32, #tpu.memory_space<vmem>>, vector<8x1xf32>
      %41 = math.log %40 : vector<8x1xf32>
      %42 = arith.addf %39, %41 : vector<8x1xf32>
      %c0_26 = arith.constant 0 : index
      %c0_27 = arith.constant 0 : index
      %43 = vector.load %arg7[%c0_26, %c0_27] : memref<8x1xf32, #tpu.memory_space<vmem>>, vector<8x1xf32>
      %44 = arith.subf %42, %43 : vector<8x1xf32>
      %c0_28 = arith.constant 0 : index
      %c0_29 = arith.constant 0 : index
      %45 = vector.load %arg4[%c0_28, %c0_29] : memref<8x1xf32, #tpu.memory_space<vmem>>, vector<8x1xf32>
      tpu.vector_store %arg4[%c0_28, %c0_29], %44 {strides = array<i32>} : memref<8x1xf32, #tpu.memory_space<vmem>>, vector<8x1xf32>,
    } else {
    }
    return
  }
  func.func @transform_0(%arg0: i32, %arg1: i32) -> (i32, i32) {
    %c0_i32 = arith.constant 0 : i32
    return %arg0, %arg1 : i32, i32
  }
  func.func @transform_1(%arg0: i32, %arg1: i32) -> (i32, i32) {
    %c0_i32 = arith.constant 0 : i32
    %c0_i32_0 = arith.constant 0 : i32
    return %arg0, %c0_i32 : i32, i32
  }
  func.func @transform_2(%arg0: i32, %arg1: i32) -> (i32, i32) {
    %c0_i32 = arith.constant 0 : i32
    %c0_i32_0 = arith.constant 0 : i32
    return %arg0, %c0_i32 : i32, i32
  }
}

</mosaic_0001>

<bundles_post_ra>
// kernel: tpu_custom_call.1
= control target key start
LH: loop header
LB: loop body
LE: loop exit
PB: predicated region body
PF: predicated region fallthrough
CT: control target
= control target key end

     0   :  { %vm15_vm0 = vcmask 7168   ;;  %vm32_vm1 = vcmask 261120   ;;  %v90_v1 = vmov -inf   ;;  %v91_v4 = vmov 0   ;;  %s127_s0 = inlined_call_operand.vmem [shape: f32[8,32], index: 0, kind: input, shape index: {}]   ;;  %s128_s1 = inlined_call_operand.vmem [shape: s32[8,1], index: 1, kind: input, shape index: {}]   ;;  %s129_s2 = inlined_call_operand.vmem [shape: f32[8,1], index: 2, kind: output, shape index: {}]  }
   0x1   :  { %v19_v0 = vld [vmem:[%s127_s0] sm:$0xff]  ;;  %16 = vst.msk [vmem:[#allocation2] sm:$0xff] %vm15_vm0, %v90_v1  ;;  %82 = vset.pattern.permute.xlu0 %v91_v4  ;;  %83 = vset.pattern.permute.xlu1 %v91_v4  ;;  %v92_v6 = vmov 0.0   ;;  %v22_v14 = vlaneseq }
   0x2   :  { %v39_v2 = vadd.f32 1e-12, %v19_v0  ;;  %v20_v5 = vld [vmem:[%s128_s1] sm:$0xff]  ;;  %17 = vst.msk [vmem:[#allocation3] sm:$0xff] %vm15_vm0, %v92_v6  ;;  %18 = vst.msk [vmem:[#allocation4] sm:$0xff] %vm15_vm0, %v92_v6 }
   0x3   :  { %28 = vperm.xlu1 %83, %v20_v5   ;;  %v23_v15 = vand.u32 127, %v22_v14 }
   0x4   :  { %v41_v3 = vsel %vm32_vm1, %v39_v2, -inf }
   0x5   :  { %42 = vmax.xlane.f32.xlu0 %v41_v3 }
   0x8   :  { %v40_v7 = vld [vmem:[#allocation2] sm:$0xff] }
   0x9   :  { %v45_v23 = vld [vmem:[#allocation3] sm:$0xff]  ;;  %v26_v27 = vld [vmem:[#allocation4] sm:$0xff] }
  0x7e   :  { %v29_v16 = vpop.permute.xlu1 %28 }
  0x7f   :  { %vm30_vm2 = vcmp.eq.s32.totalorder %v23_v15, %v29_v16 }
  0x80   :  { %v31_v18 = vsel %vm30_vm2, %v19_v0, 0.0 }
  0x81   :  { %v33_v20 = vsel %vm32_vm1, %v31_v18, 0.0 }
  0x8e   :  { %v43_v8 = vpop.xlane.xlu0 %42 }
  0x8f   :  { %v44_v9 = vmax.f32 %v40_v7, %v43_v8 }
  0x91   :  { %v46_v10 = vsub.f32 %v40_v7, %v44_v9  ;;  %63 = vst.msk [vmem:[#allocation2] sm:$0xff] %vm15_vm0, %v44_v9  ;;  %52 = vperm.xlu0 %82, %v44_v9  }
  0x93   :  { %v47_v21 = vmul.f32 1.442695, %v46_v10 }
  0x98   :  { %v67_v33 = vld [vmem:[#allocation2] sm:$0xff] }
 0x10c   :  { %v53_v11 = vpop.permute.xlu0 %52 }
 0x10d   :  { %v55_v12 = vsub.f32 %v39_v2, %v53_v11 }
 0x10f   :  { %v56_v13 = vmul.f32 1.442695, %v55_v12 }
 0x111   :  { %84 = vpow2.f32 %v56_v13 }
 0x112   :  { %86 = vpow2.f32 %v47_v21 }
 0x11e   :  { %v85_v17 = vpop.eup %84 }
 0x11f   :  { %v58_v19 = vsel %vm32_vm1, %v85_v17, 0.0  ;;  %v87_v22 = vpop.eup %86 }
 0x120   :  { %59 = vadd.xlane.f32.xlu1 %v58_v19  ;;  %v49_v24 = vmul.f32 %v87_v22, %v45_v23 }
 0x124   :  { %34 = vadd.xlane.f32.xlu1 %v33_v20 }
 0x1a9   :  { %v60_v25 = vpop.xlane.xlu1 %59 }
 0x1aa   :  { %v61_v26 = vadd.f32 %v60_v25, %v49_v24 }
 0x1ac   :  { %62 = vst.msk [vmem:[#allocation3] sm:$0xff] %vm15_vm0, %v61_v26 }
 0x1ad   :  { %v35_v28 = vpop.xlane.xlu1 %34 }
 0x1ae   :  { %v36_v29 = vadd.f32 %v35_v28, %v26_v27 }
 0x1b0   :  { %38 = vst.msk [vmem:[#allocation4] sm:$0xff] %vm15_vm0, %v36_v29 }
 0x1b3   :  { %v68_v30 = vld [vmem:[#allocation3] sm:$0xff] }
 0x1b4   :  { %88 = vlog2.f32 %v68_v30 }
 0x1b7   :  { %v72_v34 = vld [vmem:[#allocation4] sm:$0xff] }
 0x1c1   :  { %v89_v31 = vpop.eup %88 }
 0x1c2   :  { %v70_v32 = vmul.f32 0.6931472, %v89_v31 }
 0x1c4   :  { %v71_v35 = vadd.f32 %v70_v32, %v67_v33 }
 0x1c6   :  { %v73_v36 = vsub.f32 %v71_v35, %v72_v34 }
 0x1c8   :  { %74 = vst.msk [vmem:[%s129_s2] sm:$0xff] %vm15_vm0, %v73_v36 }

</bundles_post_ra>
